<compile_context>
chip_gen: v6e
topology: v6e:2x2x1
jax: 0.10.0
libtpu: 0.0.40
codegen_flags: <defaults>
</compile_context>

<pallas_src>
import functools

import jax
import jax.numpy as jnp
from jax import lax
from jax.experimental import pallas as pl
from jax.experimental.pallas import tpu as pltpu


def _round_up(x, m):
    return (x + m - 1) // m * m


def _vmem_cap_bytes():
    """Per-generation cap on scoped VMEM (v7x has only 64 MiB physical)."""
    try:
        phys = int(pltpu.get_tpu_info().vmem_capacity_bytes)
    except Exception:
        phys = 64 * 2**20  # conservative fallback (v7x-sized)
    return int(min(phys * 3 // 4, 100 * 2**20))


# ----------------------------------------------------------------------------
# Shared helper: one (Cout, TM) f32 conv tile from the resident input row.
# Each tap's window start is decomposed into a 128-aligned dynamic part
# (g*TM + base) plus a static residue, so every dynamic lane slice is aligned.
# ----------------------------------------------------------------------------
def _conv_tile(x_ref, w_ref, col0, *, offsets, tm, single_dot):
    def tap(off):
        base = (off // 128) * 128          # static, multiple of 128
        rem = off - base                    # static residue < 128
        start = pl.multiple_of(col0 + base, 128)
        if rem == 0:
            return x_ref[0, :, pl.ds(start, tm)]
        return x_ref[0, :, pl.ds(start, tm + 128)][:, rem:rem + tm]

    if single_dot:
        # (K*Cin, TM) operand: fills the MXU contraction depth; accumulation
        # happens inside the MXU (MRB on v7x) instead of on the VPU.
        xk = jnp.concatenate([tap(off) for off in offsets], axis=0)
        return jnp.dot(w_ref[...], xk, preferred_element_type=jnp.float32)

    acc = jnp.dot(w_ref[0], tap(offsets[0]), preferred_element_type=jnp.float32)
    for k in range(1, len(offsets)):
        acc = acc + jnp.dot(w_ref[k], tap(offsets[k]),
                            preferred_element_type=jnp.float32)
    return acc


# ----------------------------------------------------------------------------
# Pass 1: per-(sample, lane-tile) sum / sum-of-squares partials (no y write).
# ----------------------------------------------------------------------------
def _stats_kernel(x_ref, w_ref, sum_ref, ssq_ref, *,
                  offsets, tm, m_valid, has_tail, single_dot):
    g = pl.program_id(1)
    col0 = pl.multiple_of(g * tm, 128)
    acc = _conv_tile(x_ref, w_ref, col0, offsets=offsets, tm=tm,
                     single_dot=single_dot)
    if has_tail:
        # Only the last lane tile has invalid columns; for earlier tiles the
        # limit is >= tm so the mask is all-true.
        col = lax.broadcasted_iota(jnp.int32, acc.shape, 1)
        acc = jnp.where(col < (m_valid - g * tm), acc, 0.0)
    sum_ref[0, 0] = jnp.sum(acc, axis=1, keepdims=True)
    ssq_ref[0, 0] = jnp.sum(acc * acc, axis=1, keepdims=True)


# ----------------------------------------------------------------------------
# Pass 2: recompute the conv tile and apply the BN affine (single output write).
# ----------------------------------------------------------------------------
def _conv_bn_kernel(x_ref, w_ref, scale_ref, shift_ref, o_ref, *,
                    offsets, tm, single_dot):
    g = pl.program_id(1)
    col0 = pl.multiple_of(g * tm, 128)
    acc = _conv_tile(x_ref, w_ref, col0, offsets=offsets, tm=tm,
                     single_dot=single_dot)
    o_ref[0] = (acc * scale_ref[...] + shift_ref[...]).astype(o_ref.dtype)


# ----------------------------------------------------------------------------
# Wrapper
# ----------------------------------------------------------------------------
@functools.partial(jax.jit, static_argnames=("kernel_size", "stride", "dilation",
                                              "matmul_dtype"))
def temporal_conv_pallas(x, w_flat, bias, gamma, beta, *, kernel_size, stride=1,
                         dilation=1, eps=1e-5, matmul_dtype=jnp.bfloat16):
    """x: (N, Cin, T, V). w_flat: (K*Cin, Cout) with row index k*Cin + cin.
    bias/gamma/beta: (Cout,). Returns (N, Cout, T_out, V).

    `bias` is accepted for interface parity but intentionally NOT added: the
    training-mode BatchNorm mean subtraction cancels any per-channel constant
    exactly, so the forward output is mathematically identical."""
    del bias  # exactly cancelled by the BN mean subtraction

    N, Cin, T, V = x.shape
    K = kernel_size
    Cout = w_flat.shape[1]
    pad = (K + (K - 1) * (dilation - 1) - 1) // 2
    dil_k = (K - 1) * dilation + 1
    T_out = (T + 2 * pad - dil_k) // stride + 1
    M_valid = T_out * V
    out_dtype = x.dtype

    cdt = jnp.dtype(matmul_dtype)
    x_c = x.astype(cdt)                                # bf16 in HBM end-to-end
    x_p = jnp.pad(x_c, ((0, 0), (0, 0), (pad, pad), (0, 0)))

    if stride == 1:
        # Fast path: a time shift of k*dilation is a flat shift of k*dilation*V.
        x_flat = x_p.reshape(N, Cin, (T + 2 * pad) * V)
        offsets = tuple(k * dilation * V for k in range(K))
    else:
        # stride > 1: pre-gather the K strided time slices (rare path only).
        slices = []
        for k in range(K):
            start = k * dilation
            sl = lax.slice(x_p, (0, 0, start, 0),
                           (N, Cin, start + (T_out - 1) * stride + 1, V),
                           (1, 1, stride, 1))          # (N, Cin, T_out, V)
            slices.append(sl)
        x_flat = jnp.concatenate(slices, axis=2).reshape(N, Cin, K * M_valid)
        offsets = tuple(k * M_valid for k in range(K))
    max_off = offsets[-1]

    # Lane-tile size: as large as comfortably fits (measured HBM roofline needs
    # >=512 lanes), bounded so the f32 temporaries stay small on v7x.
    TM = 2048
    while TM > 256 and Cout * TM * 24 > 12 * 2**20:
        TM //= 2
    TM = min(TM, _round_up(M_valid, 128))
    G = -(-M_valid // TM)
    has_tail = (G * TM != M_valid)

    # Pad the flat axis so every in-kernel tap window stays in bounds.
    max_base = (max_off // 128) * 128
    L_needed = G * TM + max_base + 128
    if x_flat.shape[2] < L_needed:
        x_flat = jnp.pad(x_flat, ((0, 0), (0, 0), (0, L_needed - x_flat.shape[2])))
    L = x_flat.shape[2]

    # Weight layouts (static choice of matmul strategy).
    single_dot = (Cin % 8 == 0) and (K * Cin <= 256)
    if single_dot:
        w_arr = jnp.asarray(w_flat).T.astype(cdt)          # (Cout, K*Cin)
        w_spec = pl.BlockSpec((Cout, K * Cin), lambda n, g: (0, 0))
    else:
        w_arr = (jnp.asarray(w_flat).reshape(K, Cin, Cout)
                 .transpose(0, 2, 1).astype(cdt))          # (K, Cout, Cin)
        w_spec = pl.BlockSpec((K, Cout, Cin), lambda n, g: (0, 0, 0))

    cap = _vmem_cap_bytes()
    xb = x_flat.dtype.itemsize
    w_bytes = w_arr.size * w_arr.dtype.itemsize

    # ---------------- pass 1: batch-statistics partials ----------------
    est1 = (2 * Cin * L * xb + 2 * w_bytes + 4 * Cout * 4 * 2
            + K * Cin * (TM + 128) * xb + 4 * Cout * TM * 4)
    vmem1 = int(min(cap, max(32 * 2**20, 2 * est1)))

    sum_p, ssq_p = pl.pallas_call(
        functools.partial(_stats_kernel, offsets=offsets, tm=TM, m_valid=M_valid,
                          has_tail=has_tail, single_dot=single_dot),
        out_shape=(jax.ShapeDtypeStruct((N, G, Cout, 1), jnp.float32),
                   jax.ShapeDtypeStruct((N, G, Cout, 1), jnp.float32)),
        grid_spec=pltpu.PrefetchScalarGridSpec(
            num_scalar_prefetch=0,
            grid=(N, G),
            in_specs=[
                pl.BlockSpec((1, Cin, L), lambda n, g: (n, 0, 0)),   # row stays resident over g
                w_spec,
            ],
            out_specs=[
                pl.BlockSpec((1, 1, Cout, 1), lambda n, g: (n, g, 0, 0)),
                pl.BlockSpec((1, 1, Cout, 1), lambda n, g: (n, g, 0, 0)),
            ],
        ),
        compiler_params=pltpu.CompilerParams(
            dimension_semantics=("parallel", "parallel"),
            vmem_limit_bytes=vmem1),
    )(x_flat, w_arr)

    # ---------------- tiny glue: reduce partials, BN scale/shift ----------------
    count = jnp.float32(N * M_valid)
    ch_sum = jnp.sum(sum_p[..., 0], axis=(0, 1))                  # (Cout,)
    ch_ssq = jnp.sum(ssq_p[..., 0], axis=(0, 1))                  # (Cout,)
    mean = ch_sum / count
    var = jnp.maximum(ch_ssq / count - mean * mean, 0.0)          # biased var (BN fwd)
    inv_std = lax.rsqrt(var + eps)
    g32 = gamma.astype(jnp.float32)
    scale = (g32 * inv_std).reshape(Cout, 1)
    shift = (beta.astype(jnp.float32) - mean * g32 * inv_std).reshape(Cout, 1)

    # ---------------- pass 2: recompute conv tile + BN affine, single write -----
    est2 = (2 * Cin * L * xb + 2 * w_bytes + 2 * Cout * TM * out_dtype.itemsize
            + 4 * Cout * 4 + K * Cin * (TM + 128) * xb + 3 * Cout * TM * 4)
    vmem2 = int(min(cap, max(32 * 2**20, 2 * est2)))

    out_flat = pl.pallas_call(
        functools.partial(_conv_bn_kernel, offsets=offsets, tm=TM,
                          single_dot=single_dot),
        out_shape=jax.ShapeDtypeStruct((N, Cout, M_valid), out_dtype),
        grid_spec=pltpu.PrefetchScalarGridSpec(
            num_scalar_prefetch=0,
            grid=(N, G),
            in_specs=[
                pl.BlockSpec((1, Cin, L), lambda n, g: (n, 0, 0)),
                w_spec,
                pl.BlockSpec((Cout, 1), lambda n, g: (0, 0)),
                pl.BlockSpec((Cout, 1), lambda n, g: (0, 0)),
            ],
            out_specs=pl.BlockSpec((1, Cout, TM), lambda n, g: (n, 0, g)),
        ),
        compiler_params=pltpu.CompilerParams(
            dimension_semantics=("parallel", "parallel"),
            vmem_limit_bytes=vmem2),
    )(x_flat, w_arr, scale, shift)

    # Channel-major layout => this reshape is free (no transpose, no slice).
    return out_flat.reshape(N, Cout, T_out, V)


# ----------------------------------------------------------------------------
# Pure-JAX reference (Conv2d with bias + training-mode BatchNorm2d), f32.
# ----------------------------------------------------------------------------
def temporal_conv_ref(x, w_flat, bias, gamma, beta, *,
                      kernel_size, stride=1, dilation=1, eps=1e-5):
    K = kernel_size
    Cin = x.shape[1]
    Cout = w_flat.shape[1]
    pad = (K + (K - 1) * (dilation - 1) - 1) // 2
    w_conv = w_flat.reshape(K, Cin, Cout).transpose(2, 1, 0)[..., None]
    y = lax.conv_general_dilated(
        x, w_conv, window_strides=(stride, 1),
        padding=[(pad, pad), (0, 0)], rhs_dilation=(dilation, 1),
        dimension_numbers=("NCHW", "OIHW", "NCHW"))
    y = y + bias.reshape(1, Cout, 1, 1)
    mean = jnp.mean(y, axis=(0, 2, 3), keepdims=True)
    var = jnp.mean((y - mean) ** 2, axis=(0, 2, 3), keepdims=True)
    y_hat = (y - mean) * lax.rsqrt(var + eps)
    return y_hat * gamma.reshape(1, Cout, 1, 1) + beta.reshape(1, Cout, 1, 1)


if __name__ == "__main__":
    # Small deterministic example: N=2, Cin=4, T=16, V=16, Cout=8, kernel_size=3
    N, Cin, T, V = 2, 4, 16, 16
    Cout, K, stride, dilation = 8, 3, 1, 1

    key = jax.random.PRNGKey(0)
    kx, kw, kb, kg, kbeta = jax.random.split(key, 5)
    x = jax.random.normal(kx, (N, Cin, T, V), dtype=jnp.float32)
    w_flat = jax.random.normal(kw, (K * Cin, Cout), dtype=jnp.float32) * 0.1
    bias = jax.random.normal(kb, (Cout,), dtype=jnp.float32) * 0.1
    gamma = 1.0 + 0.1 * jax.random.normal(kg, (Cout,), dtype=jnp.float32)
    beta = 0.1 * jax.random.normal(kbeta, (Cout,), dtype=jnp.float32)

    out = temporal_conv_pallas(x, w_flat, bias, gamma, beta,
                               kernel_size=K, stride=stride, dilation=dilation)
    out = jax.block_until_ready(out)

    ref = temporal_conv_ref(x, w_flat, bias, gamma, beta,
                            kernel_size=K, stride=stride, dilation=dilation)
    assert out.shape == (N, Cout, T, V), out.shape
    err = float(jnp.max(jnp.abs(out.astype(jnp.float32) - ref)))
    # bf16 MXU operands vs. f32 reference -> loose but meaningful tolerance.
    assert err < 1e-1, err

    print("KERNEL_OK")
</pallas_src>

<mosaic_0001>
module attributes {stable_mosaic.version = 11 : i64} {
  func.func @_stats_kernel(%arg0: i32, %arg1: i32, %arg2: memref<1x4x384xbf16, #tpu.memory_space<vmem>>, %arg3: memref<3x8x4xbf16, #tpu.memory_space<vmem>>, %arg4: memref<1x1x8x1xf32, #tpu.memory_space<vmem>>, %arg5: memref<1x1x8x1xf32, #tpu.memory_space<vmem>>) attributes {dimension_semantics = [#tpu.dimension_semantics<parallel>, #tpu.dimension_semantics<parallel>], iteration_bounds = array<i64: 2, 1>, scalar_prefetch = 0 : i64, scratch_operands = 0 : i64, tpu.core_type = #tpu.core_type<tc>, window_params = [{transform_indices = @transform_0, window_bounds = array<i64: 1, 4, 384>}, {pipeline_mode = #tpu.pipeline_mode<synchronous>, transform_indices = @transform_1, window_bounds = array<i64: 3, 8, 4>}, {transform_indices = @transform_2, window_bounds = array<i64: 1, 1, 8, 1>}, {transform_indices = @transform_3, window_bounds = array<i64: 1, 1, 8, 1>}]} {
    %c256_i32 = arith.constant 256 : i32
    %0 = arith.muli %arg1, %c256_i32 : i32
    %1 = tpu.assume_multiple %0, 128 : i32
    %c0 = arith.constant 0 : index
    %c0_0 = arith.constant 0 : index
    %c0_1 = arith.constant 0 : index
    %2 = vector.load %arg3[%c0, %c0_0, %c0_1] : memref<3x8x4xbf16, #tpu.memory_space<vmem>>, vector<1x8x4xbf16>
    %3 = vector.shape_cast %2 : vector<1x8x4xbf16> to vector<8x4xbf16>
    %c0_i32 = arith.constant 0 : i32
    %4 = arith.addi %1, %c0_i32 : i32
    %5 = tpu.assume_multiple %4, 128 : i32
    %c0_2 = arith.constant 0 : index
    %c0_3 = arith.constant 0 : index
    %6 = arith.index_cast %5 : i32 to index
    %7 = vector.load %arg2[%c0_2, %c0_3, %6] : memref<1x4x384xbf16, #tpu.memory_space<vmem>>, vector<1x4x256xbf16>
    %8 = vector.shape_cast %7 : vector<1x4x256xbf16> to vector<4x256xbf16>
    %cst = arith.constant dense<0.000000e+00> : vector<8x256xf32>
    %9 = tpu.matmul %3, %8, %cst {dimension_numbers = #tpu.dot_dimension_numbers<[1], [0], [0], [1], [0, 0, 1, 1], [], []>} : vector<8x4xbf16>, vector<4x256xbf16>, vector<8x256xf32> -> vector<8x256xf32>
    %c1 = arith.constant 1 : index
    %c0_4 = arith.constant 0 : index
    %c0_5 = arith.constant 0 : index
    %10 = vector.load %arg3[%c1, %c0_4, %c0_5] : memref<3x8x4xbf16, #tpu.memory_space<vmem>>, vector<1x8x4xbf16>
    %11 = vector.shape_cast %10 : vector<1x8x4xbf16> to vector<8x4xbf16>
    %c0_i32_6 = arith.constant 0 : i32
    %12 = arith.addi %1, %c0_i32_6 : i32
    %13 = tpu.assume_multiple %12, 128 : i32
    %c0_7 = arith.constant 0 : index
    %c0_8 = arith.constant 0 : index
    %14 = arith.index_cast %13 : i32 to index
    %15 = vector.load %arg2[%c0_7, %c0_8, %14] : memref<1x4x384xbf16, #tpu.memory_space<vmem>>, vector<1x4x384xbf16>
    %16 = vector.shape_cast %15 : vector<1x4x384xbf16> to vector<4x384xbf16>
    %17 = vector.extract_strided_slice %16 {offsets = [0, 16], sizes = [4, 256], strides = [1, 1]} : vector<4x384xbf16> to vector<4x256xbf16>
    %cst_9 = arith.constant dense<0.000000e+00> : vector<8x256xf32>
    %18 = tpu.matmul %11, %17, %cst_9 {dimension_numbers = #tpu.dot_dimension_numbers<[1], [0], [0], [1], [0, 0, 1, 1], [], []>} : vector<8x4xbf16>, vector<4x256xbf16>, vector<8x256xf32> -> vector<8x256xf32>
    %19 = arith.addf %9, %18 : vector<8x256xf32>
    %c2 = arith.constant 2 : index
    %c0_10 = arith.constant 0 : index
    %c0_11 = arith.constant 0 : index
    %20 = vector.load %arg3[%c2, %c0_10, %c0_11] : memref<3x8x4xbf16, #tpu.memory_space<vmem>>, vector<1x8x4xbf16>
    %21 = vector.shape_cast %20 : vector<1x8x4xbf16> to vector<8x4xbf16>
    %c0_i32_12 = arith.constant 0 : i32
    %22 = arith.addi %1, %c0_i32_12 : i32
    %23 = tpu.assume_multiple %22, 128 : i32
    %c0_13 = arith.constant 0 : index
    %c0_14 = arith.constant 0 : index
    %24 = arith.index_cast %23 : i32 to index
    %25 = vector.load %arg2[%c0_13, %c0_14, %24] : memref<1x4x384xbf16, #tpu.memory_space<vmem>>, vector<1x4x384xbf16>
    %26 = vector.shape_cast %25 : vector<1x4x384xbf16> to vector<4x384xbf16>
    %27 = vector.extract_strided_slice %26 {offsets = [0, 32], sizes = [4, 256], strides = [1, 1]} : vector<4x384xbf16> to vector<4x256xbf16>
    %cst_15 = arith.constant dense<0.000000e+00> : vector<8x256xf32>
    %28 = tpu.matmul %21, %27, %cst_15 {dimension_numbers = #tpu.dot_dimension_numbers<[1], [0], [0], [1], [0, 0, 1, 1], [], []>} : vector<8x4xbf16>, vector<4x256xbf16>, vector<8x256xf32> -> vector<8x256xf32>
    %29 = arith.addf %19, %28 : vector<8x256xf32>
    %cst_16 = arith.constant dense<0.000000e+00> : vector<8xf32>
    %30 = vector.multi_reduction <add>, %29, %cst_16 [1] : vector<8x256xf32> to vector<8xf32>
    %31 = vector.shape_cast %30 : vector<8xf32> to vector<8x1xf32>
    %c0_17 = arith.constant 0 : index
    %c0_18 = arith.constant 0 : index
    %c0_19 = arith.constant 0 : index
    %c0_20 = arith.constant 0 : index
    %32 = vector.load %arg4[%c0_17, %c0_18, %c0_19, %c0_20] : memref<1x1x8x1xf32, #tpu.memory_space<vmem>>, vector<1x1x8x1xf32>
    %33 = vector.shape_cast %32 : vector<1x1x8x1xf32> to vector<8x1xf32>
    %34 = vector.shape_cast %31 : vector<8x1xf32> to vector<1x1x8x1xf32>
    tpu.vector_store %arg4[%c0_17, %c0_18, %c0_19, %c0_20], %34 {strides = array<i32>} : memref<1x1x8x1xf32, #tpu.memory_space<vmem>>, vector<1x1x8x1xf32>,
    %35 = arith.mulf %29, %29 : vector<8x256xf32>
    %cst_21 = arith.constant dense<0.000000e+00> : vector<8xf32>
    %36 = vector.multi_reduction <add>, %35, %cst_21 [1] : vector<8x256xf32> to vector<8xf32>
    %37 = vector.shape_cast %36 : vector<8xf32> to vector<8x1xf32>
    %c0_22 = arith.constant 0 : index
    %c0_23 = arith.constant 0 : index
    %c0_24 = arith.constant 0 : index
    %c0_25 = arith.constant 0 : index
    %38 = vector.load %arg5[%c0_22, %c0_23, %c0_24, %c0_25] : memref<1x1x8x1xf32, #tpu.memory_space<vmem>>, vector<1x1x8x1xf32>
    %39 = vector.shape_cast %38 : vector<1x1x8x1xf32> to vector<8x1xf32>
    %40 = vector.shape_cast %37 : vector<8x1xf32> to vector<1x1x8x1xf32>
    tpu.vector_store %arg5[%c0_22, %c0_23, %c0_24, %c0_25], %40 {strides = array<i32>} : memref<1x1x8x1xf32, #tpu.memory_space<vmem>>, vector<1x1x8x1xf32>,
    return
  }
  func.func @transform_0(%arg0: i32, %arg1: i32) -> (i32, i32, i32) {
    %c0_i32 = arith.constant 0 : i32
    %c0_i32_0 = arith.constant 0 : i32
    %c0_i32_1 = arith.constant 0 : i32
    return %arg0, %c0_i32, %c0_i32_0 : i32, i32, i32
  }
  func.func @transform_1(%arg0: i32, %arg1: i32) -> (i32, i32, i32) {
    %c0_i32 = arith.constant 0 : i32
    %c0_i32_0 = arith.constant 0 : i32
    %c0_i32_1 = arith.constant 0 : i32
    %c0_i32_2 = arith.constant 0 : i32
    return %c0_i32, %c0_i32_0, %c0_i32_1 : i32, i32, i32
  }
  func.func @transform_2(%arg0: i32, %arg1: i32) -> (i32, i32, i32, i32) {
    %c0_i32 = arith.constant 0 : i32
    %c0_i32_0 = arith.constant 0 : i32
    %c0_i32_1 = arith.constant 0 : i32
    return %arg0, %arg1, %c0_i32, %c0_i32_0 : i32, i32, i32, i32
  }
  func.func @transform_3(%arg0: i32, %arg1: i32) -> (i32, i32, i32, i32) {
    %c0_i32 = arith.constant 0 : i32
    %c0_i32_0 = arith.constant 0 : i32
    %c0_i32_1 = arith.constant 0 : i32
    return %arg0, %arg1, %c0_i32, %c0_i32_0 : i32, i32, i32, i32
  }
}

module attributes {stable_mosaic.version = 11 : i64} {
  func.func @_conv_bn_kernel(%arg0: i32, %arg1: i32, %arg2: memref<1x4x384xbf16, #tpu.memory_space<vmem>>, %arg3: memref<3x8x4xbf16, #tpu.memory_space<vmem>>, %arg4: memref<8x1xf32, #tpu.memory_space<vmem>>, %arg5: memref<8x1xf32, #tpu.memory_space<vmem>>, %arg6: memref<1x8x256xf32, #tpu.memory_space<vmem>>) attributes {dimension_semantics = [#tpu.dimension_semantics<parallel>, #tpu.dimension_semantics<parallel>], iteration_bounds = array<i64: 2, 1>, scalar_prefetch = 0 : i64, scratch_operands = 0 : i64, tpu.core_type = #tpu.core_type<tc>, window_params = [{transform_indices = @transform_0, window_bounds = array<i64: 1, 4, 384>}, {pipeline_mode = #tpu.pipeline_mode<synchronous>, transform_indices = @transform_1, window_bounds = array<i64: 3, 8, 4>}, {pipeline_mode = #tpu.pipeline_mode<synchronous>, transform_indices = @transform_2, window_bounds = array<i64: 8, 1>}, {pipeline_mode = #tpu.pipeline_mode<synchronous>, transform_indices = @transform_3, window_bounds = array<i64: 8, 1>}, {transform_indices = @transform_4, window_bounds = array<i64: 1, 8, 256>}]} {
    %c256_i32 = arith.constant 256 : i32
    %0 = arith.muli %arg1, %c256_i32 : i32
    %1 = tpu.assume_multiple %0, 128 : i32
    %c0 = arith.constant 0 : index
    %c0_0 = arith.constant 0 : index
    %c0_1 = arith.constant 0 : index
    %2 = vector.load %arg3[%c0, %c0_0, %c0_1] : memref<3x8x4xbf16, #tpu.memory_space<vmem>>, vector<1x8x4xbf16>
    %3 = vector.shape_cast %2 : vector<1x8x4xbf16> to vector<8x4xbf16>
    %c0_i32 = arith.constant 0 : i32
    %4 = arith.addi %1, %c0_i32 : i32
    %5 = tpu.assume_multiple %4, 128 : i32
    %c0_2 = arith.constant 0 : index
    %c0_3 = arith.constant 0 : index
    %6 = arith.index_cast %5 : i32 to index
    %7 = vector.load %arg2[%c0_2, %c0_3, %6] : memref<1x4x384xbf16, #tpu.memory_space<vmem>>, vector<1x4x256xbf16>
    %8 = vector.shape_cast %7 : vector<1x4x256xbf16> to vector<4x256xbf16>
    %cst = arith.constant dense<0.000000e+00> : vector<8x256xf32>
    %9 = tpu.matmul %3, %8, %cst {dimension_numbers = #tpu.dot_dimension_numbers<[1], [0], [0], [1], [0, 0, 1, 1], [], []>} : vector<8x4xbf16>, vector<4x256xbf16>, vector<8x256xf32> -> vector<8x256xf32>
    %c1 = arith.constant 1 : index
    %c0_4 = arith.constant 0 : index
    %c0_5 = arith.constant 0 : index
    %10 = vector.load %arg3[%c1, %c0_4, %c0_5] : memref<3x8x4xbf16, #tpu.memory_space<vmem>>, vector<1x8x4xbf16>
    %11 = vector.shape_cast %10 : vector<1x8x4xbf16> to vector<8x4xbf16>
    %c0_i32_6 = arith.constant 0 : i32
    %12 = arith.addi %1, %c0_i32_6 : i32
    %13 = tpu.assume_multiple %12, 128 : i32
    %c0_7 = arith.constant 0 : index
    %c0_8 = arith.constant 0 : index
    %14 = arith.index_cast %13 : i32 to index
    %15 = vector.load %arg2[%c0_7, %c0_8, %14] : memref<1x4x384xbf16, #tpu.memory_space<vmem>>, vector<1x4x384xbf16>
    %16 = vector.shape_cast %15 : vector<1x4x384xbf16> to vector<4x384xbf16>
    %17 = vector.extract_strided_slice %16 {offsets = [0, 16], sizes = [4, 256], strides = [1, 1]} : vector<4x384xbf16> to vector<4x256xbf16>
    %cst_9 = arith.constant dense<0.000000e+00> : vector<8x256xf32>
    %18 = tpu.matmul %11, %17, %cst_9 {dimension_numbers = #tpu.dot_dimension_numbers<[1], [0], [0], [1], [0, 0, 1, 1], [], []>} : vector<8x4xbf16>, vector<4x256xbf16>, vector<8x256xf32> -> vector<8x256xf32>
    %19 = arith.addf %9, %18 : vector<8x256xf32>
    %c2 = arith.constant 2 : index
    %c0_10 = arith.constant 0 : index
    %c0_11 = arith.constant 0 : index
    %20 = vector.load %arg3[%c2, %c0_10, %c0_11] : memref<3x8x4xbf16, #tpu.memory_space<vmem>>, vector<1x8x4xbf16>
    %21 = vector.shape_cast %20 : vector<1x8x4xbf16> to vector<8x4xbf16>
    %c0_i32_12 = arith.constant 0 : i32
    %22 = arith.addi %1, %c0_i32_12 : i32
    %23 = tpu.assume_multiple %22, 128 : i32
    %c0_13 = arith.constant 0 : index
    %c0_14 = arith.constant 0 : index
    %24 = arith.index_cast %23 : i32 to index
    %25 = vector.load %arg2[%c0_13, %c0_14, %24] : memref<1x4x384xbf16, #tpu.memory_space<vmem>>, vector<1x4x384xbf16>
    %26 = vector.shape_cast %25 : vector<1x4x384xbf16> to vector<4x384xbf16>
    %27 = vector.extract_strided_slice %26 {offsets = [0, 32], sizes = [4, 256], strides = [1, 1]} : vector<4x384xbf16> to vector<4x256xbf16>
    %cst_15 = arith.constant dense<0.000000e+00> : vector<8x256xf32>
    %28 = tpu.matmul %21, %27, %cst_15 {dimension_numbers = #tpu.dot_dimension_numbers<[1], [0], [0], [1], [0, 0, 1, 1], [], []>} : vector<8x4xbf16>, vector<4x256xbf16>, vector<8x256xf32> -> vector<8x256xf32>
    %29 = arith.addf %19, %28 : vector<8x256xf32>
    %c0_16 = arith.constant 0 : index
    %c0_17 = arith.constant 0 : index
    %30 = vector.load %arg4[%c0_16, %c0_17] : memref<8x1xf32, #tpu.memory_space<vmem>>, vector<8x1xf32>
    %31 = vector.broadcast %30 : vector<8x1xf32> to vector<8x256xf32>
    %32 = arith.mulf %29, %31 : vector<8x256xf32>
    %c0_18 = arith.constant 0 : index
    %c0_19 = arith.constant 0 : index
    %33 = vector.load %arg5[%c0_18, %c0_19] : memref<8x1xf32, #tpu.memory_space<vmem>>, vector<8x1xf32>
    %34 = vector.broadcast %33 : vector<8x1xf32> to vector<8x256xf32>
    %35 = arith.addf %32, %34 : vector<8x256xf32>
    %c0_20 = arith.constant 0 : index
    %c0_21 = arith.constant 0 : index
    %c0_22 = arith.constant 0 : index
    %36 = vector.load %arg6[%c0_20, %c0_21, %c0_22] : memref<1x8x256xf32, #tpu.memory_space<vmem>>, vector<1x8x256xf32>
    %37 = vector.shape_cast %36 : vector<1x8x256xf32> to vector<8x256xf32>
    %38 = vector.shape_cast %35 : vector<8x256xf32> to vector<1x8x256xf32>
    tpu.vector_store %arg6[%c0_20, %c0_21, %c0_22], %38 {strides = array<i32>} : memref<1x8x256xf32, #tpu.memory_space<vmem>>, vector<1x8x256xf32>,
    return
  }
  func.func @transform_0(%arg0: i32, %arg1: i32) -> (i32, i32, i32) {
    %c0_i32 = arith.constant 0 : i32
    %c0_i32_0 = arith.constant 0 : i32
    %c0_i32_1 = arith.constant 0 : i32
    return %arg0, %c0_i32, %c0_i32_0 : i32, i32, i32
  }
  func.func @transform_1(%arg0: i32, %arg1: i32) -> (i32, i32, i32) {
    %c0_i32 = arith.constant 0 : i32
    %c0_i32_0 = arith.constant 0 : i32
    %c0_i32_1 = arith.constant 0 : i32
    %c0_i32_2 = arith.constant 0 : i32
    return %c0_i32, %c0_i32_0, %c0_i32_1 : i32, i32, i32
  }
  func.func @transform_2(%arg0: i32, %arg1: i32) -> (i32, i32) {
    %c0_i32 = arith.constant 0 : i32
    %c0_i32_0 = arith.constant 0 : i32
    %c0_i32_1 = arith.constant 0 : i32
    return %c0_i32, %c0_i32_0 : i32, i32
  }
  func.func @transform_3(%arg0: i32, %arg1: i32) -> (i32, i32) {
    %c0_i32 = arith.constant 0 : i32
    %c0_i32_0 = arith.constant 0 : i32
    %c0_i32_1 = arith.constant 0 : i32
    return %c0_i32, %c0_i32_0 : i32, i32
  }
  func.func @transform_4(%arg0: i32, %arg1: i32) -> (i32, i32, i32) {
    %c0_i32 = arith.constant 0 : i32
    %c0_i32_0 = arith.constant 0 : i32
    return %arg0, %c0_i32, %arg1 : i32, i32, i32
  }
}

</mosaic_0001>

<bundles_post_ra>
// kernel: temporal_conv_pallas.2
= control target key start
LH: loop header
LB: loop body
LE: loop exit
PB: predicated region body
PF: predicated region fallthrough
CT: control target
= control target key end

     0   :  { %s641_s12 = smov 0   ;;  %s643_s13 = smov 0   ;;  %s699_s0 = inlined_call_operand.vmem [shape: bf16[2,4,384], index: 0, kind: input, shape index: {}]   ;;  %s700_s1 = inlined_call_operand.vmem [shape: bf16[3,8,4], index: 1, kind: input, shape index: {}]   ;;  %s701_s2 = inlined_call_operand.vmem [shape: f32[2,1,8,1], index: 2, kind: output, shape index: {0}]   ;;  %s702_s3 = inlined_call_operand.vmem [shape: f32[2,1,8,1], index: 3, kind: output, shape index: {1}]  }
   0x1   :  { %s645_s14 = smov 0  }
   0x2 LB: > { %s26_s15 = sadd.s32 1, %s611_s13  ;;  %p548_p0 = scmp.ge.s32.totalorder %s615_s14, 1  ;;  %s615_s14 = sphi %s645_s14, %s14_s14   ;;  %s611_s13 = sphi %s643_s13, %s704_s13   ;;  %s607_s12 = sphi %s641_s12, %s703_s12  }
   0x3   : > { %p28_p1 = scmp.ge.s32.totalorder %s26_s15, 2  ;;  %p156_p2 = scmp.lt.s32.totalorder %s615_s14, 3 }
   0x5   : > { %s706_s15 = smov (%p28_p1, %s26_s15), 0  ;;  %p157_p3 = pnand %p548_p0, %p156_p2 }
   0x6   : > { %p189_p4 = scmp.lt.s32.totalorder (!%p157_p3), %s607_s12, 1  ;;  %s619_s20 = smov (!%p157_p3), 112  }
   0x7   : > { %160 = sbr.rel (%p157_p3) target bundleno = 493 (0x1ed), region = 28  ;;  %s620_s23 = smov (!%p157_p3), 96  }
   0xc   : > { %v224_v0 = vlaneseq  ;;  %v617_v1 = vmov 1983009808   ;;  %s708_s12 = smov (!%p189_p4, %s607_s12), 1  ;;  %vm249_vm0 = vcmask 1041408   ;;  %v618_v6 = vmov 0  }
   0xd   : > { %v222_v2 = vunpack.c.l.s4 %v617_v1  ;;  %s563_s16 = smul.u32 6, %s708_s12  ;;  %288 = vmatprep.mubr.bf16.mxu0 %v618_v6  ;;  %347 = vmatprep.mubr.bf16.mxu1 %v618_v6  ;;  %vm245_vm1 = vcmask 31744   ;;  %v210_v15 = vld [vmem:[%s700_s1] sm:$0xf]  ;;  %vm242_vm2 = vcmask 916480   ;;  %vm364_vm3 = vcmask 785408  }
   0xe   : > { %v225_v3 = vshrl.u32 %v224_v0, 7  ;;  %v552_v23 = vld [vmem:[%s700_s1 + $0x4] sm:$0xf]  ;;  %v558_v29 = vld [vmem:[%s700_s1 + $0x8] sm:$0xf]  ;;  %s550_s28 = sshll.u32 %s708_s12, 3 }
   0xf   : > { %v223_v4 = vunpack.c.0.s8 %v222_v2  ;;  %s193_s19 = scalar_lea.vmem %s699_s0, %s563_s16  ;;  %s200_s4 = scalar_lea.vmem %s701_s2, %s550_s28  ;;  %vm422_vm4 = vcmask 7168  }
  0x10   : > { %v218_v7 = vld [vmem:[%s193_s19] sm:$0x3f]  ;;  %s207_s7 = scalar_lea.vmem %s702_s3, %s550_s28 }
  0x11   : > { %v226_v5 = vsub.s32 %v223_v4, %v225_v3  ;;  %v555_v8 = vld.sshfl [vmem:[%s193_s19] sm:$0x33 pattern:$0x76325410]  ;;  %v220_v10 = vcombine.high %v218_v7, %v218_v7 }
  0x12   : > { %v305_v11 = vcombine.high %v555_v8, %v555_v8  ;;  %v310_v12 = vsel %vm249_vm0, %v555_v8, 0 }
  0x13   : > { %v227_v9 = vrot.slane %v218_v7, %v226_v5  ;;  %v234_v13 = vrot.slane %v220_v10, %v226_v5 }
  0x14   : > { %556 = vmatprep.subr.msk.bf16.mxu1 %vm249_vm0, %v305_v11 }
  0x15   : > { %236 = vrot.lane.b32.xlu0 %v227_v9, %s619_s20  ;;  %v235_v14 = vcombine.high %v227_v9, %v227_v9  ;;  %330 = vmatpush1.bf16.msra.mxu1 %v310_v12 }
  0x16   : > { %240 = vrot.lane.b32.xlu1 %v234_v13, %s619_s20 }
  0x18   : > { %557 = vmatmul.mubr.msk.bf16.vlgmr.msra.gmra.mxu1 %vm245_vm1, %v210_v15 }
  0x19   : > { %238 = vrot.lane.b32.xlu0 %v235_v14, %s619_s20 }
  0x1a   : > { %358 = vrot.lane.b32.xlu1 %v227_v9, %s620_s23 }
  0x1d   : > { %360 = vrot.lane.b32.xlu0 %v235_v14, %s620_s23 }
  0x1e   : > { %362 = vrot.lane.b32.xlu1 %v234_v13, %s620_s23 }
  0x87   : > { %v237_v16 = vpop.permute.xlu0 %236 }
  0x88   : > { %v241_v17 = vpop.permute.xlu1 %240 }
  0x8b   : > { %v239_v18 = vpop.permute.xlu0 %238 }
  0x8c   : > { %v244_v19 = vsel %vm242_vm2, %v239_v18, %v241_v17  ;;  %v243_v20 = vsel %vm242_vm2, %v237_v16, %v239_v18  ;;  %v359_v21 = vpop.permute.xlu1 %358 }
  0x8d   : > { %553 = vmatprep.subr.msk.bf16.mxu0 %vm249_vm0, %v244_v19  ;;  %v251_v22 = vsel %vm249_vm0, %v243_v20, 0 }
  0x8e   : > { %271 = vmatpush1.bf16.msra.mxu0 %v251_v22 }
  0x8f   : > { %v361_v24 = vpop.permute.xlu0 %360 }
  0x90   : > { %v365_v25 = vsel %vm364_vm3, %v359_v21, %v361_v24  ;;  %v363_v26 = vpop.permute.xlu1 %362 }
  0x91   : > { %554 = vmatmul.mubr.msk.bf16.vlgmr.msra.gmra.mxu0 %vm245_vm1, %v552_v23  ;;  %v366_v27 = vsel %vm364_vm3, %v361_v24, %v363_v26  ;;  %v371_v28 = vsel %vm249_vm0, %v365_v25, 0 }
  0x92   : > { %408 = vmatprep.mubr.bf16.mxu0 %v618_v6  ;;  %559 = vmatprep.subr.msk.bf16.mxu0 %vm249_vm0, %v366_v27 }
  0x93   : > { %391 = vmatpush1.bf16.msra.mxu0 %v371_v28 }
  0x99   : > { %560 = vmatmul.mubr.msk.bf16.vlgmr.msra.gmra.mxu0 %vm245_vm1, %v558_v29 }
  0xd8   : > { %v349_v30 = vpop.f32.mrf.mxu1 }
  0xda   : > { %v351_v31 = vpop.f32.mrf.mxu1 }
  0xdc   : > { %v353_v32 = vpop.f32.mrf.mxu1 }
  0xde   : > { %v354_v33 = vpop.f32.mrf.mxu1 }
 0x151   : > { %v290_v34 = vpop.f32.mrf.mxu0 }
 0x152   : > { %v350_v38 = vadd.f32 %v349_v30, %v290_v34 }
 0x153   : > { %v292_v35 = vpop.f32.mrf.mxu0 }
 0x154   : > { %v352_v40 = vadd.f32 %v351_v31, %v292_v35 }
 0x155   : > { %v294_v36 = vpop.f32.mrf.mxu0 }
 0x157   : > { %v295_v37 = vpop.f32.mrf.mxu0 }
 0x159   : > { %v410_v39 = vpop.f32.mrf.mxu0 }
 0x15a   : > { %v417_v41 = vadd.f32 %v410_v39, %v350_v38 }
 0x15b   : > { %v412_v42 = vpop.f32.mrf.mxu0 }
 0x15c   : > { %v418_v43 = vadd.f32 %v412_v42, %v352_v40  ;;  %v424_v45 = vmul.f32 %v417_v41, %v417_v41 }
 0x15d   : > { %v414_v44 = vpop.f32.mrf.mxu0 }
 0x15e   : > { %v425_v46 = vmul.f32 %v418_v43, %v418_v43  ;;  %v419_v47 = vadd.f32 %v418_v43, %v417_v41 }
 0x15f   : > { %v415_v48 = vpop.f32.mrf.mxu0 }
 0x160   : > { %420 = vadd.xlane.f32.xlu0 %v419_v47  ;;  %v426_v49 = vadd.f32 %v425_v46, %v424_v45 }
 0x162   : > { %427 = vadd.xlane.f32.xlu1 %v426_v49 }
 0x1e9   : > { %v421_v50 = vpop.xlane.xlu0 %420 }
 0x1ea   : > { %423 = vst.msk [vmem:[%s200_s4] sm:$0xff] %vm422_vm4, %v421_v50 }
 0x1eb   : > { %v428_v51 = vpop.xlane.xlu1 %427 }
 0x1ec   : > { %429 = vst.msk [vmem:[%s207_s7] sm:$0xff] %vm422_vm4, %v428_v51 }
 0x1ed PF: > { %s14_s14 = sadd.s32 1, %s615_s14   ;;  %s703_s12 = smov %s611_s13 }
 0x1ee   : > { %p11_p5 = scmp.ge.s32.totalorder %s14_s14, 4   ;;  %s704_s13 = smov %s706_s15 }
 0x1f0   :  { %13 = sbr.rel (!%p11_p5) target bundleno = 2 (0x2), region = 73 }

// kernel: temporal_conv_pallas.3
= control target key start
LH: loop header
LB: loop body
LE: loop exit
PB: predicated region body
PF: predicated region fallthrough
CT: control target
= control target key end

     0   :  { %s638_s15 = smov 0   ;;  %s640_s16 = smov 0   ;;  %s699_s0 = inlined_call_operand.vmem [shape: bf16[2,4,384], index: 0, kind: input, shape index: {}]   ;;  %s700_s1 = inlined_call_operand.vmem [shape: bf16[3,8,4], index: 1, kind: input, shape index: {}]   ;;  %s701_s2 = inlined_call_operand.vmem [shape: f32[8,1], index: 2, kind: input, shape index: {}]   ;;  %s702_s3 = inlined_call_operand.vmem [shape: f32[8,1], index: 3, kind: input, shape index: {}]   ;;  %s703_s4 = inlined_call_operand.vmem [shape: f32[2,8,256], index: 4, kind: output, shape index: {}]  }
   0x1   :  { %s642_s17 = smov 0  }
   0x2 LB: > { %s26_s18 = sadd.s32 1, %s603_s16  ;;  %p537_p0 = scmp.ge.s32.totalorder %s607_s17, 1  ;;  %s607_s17 = sphi %s642_s17, %s14_s17   ;;  %s603_s16 = sphi %s640_s16, %s705_s16   ;;  %s599_s15 = sphi %s638_s15, %s704_s15  }
   0x3   : > { %p28_p1 = scmp.ge.s32.totalorder %s26_s18, 2  ;;  %p176_p2 = scmp.lt.s32.totalorder %s607_s17, 3 }
   0x5   : > { %s707_s18 = smov (%p28_p1, %s26_s18), 0  ;;  %p177_p3 = pnand %p537_p0, %p176_p2 }
   0x6   : > { %p206_p4 = scmp.lt.s32.totalorder (!%p177_p3), %s599_s15, 1  ;;  %s611_s23 = smov (!%p177_p3), 112  }
   0x7   : > { %180 = sbr.rel (%p177_p3) target bundleno = 355 (0x163), region = 36  ;;  %s612_s26 = smov (!%p177_p3), 96  }
   0xc   : > { %v237_v0 = vlaneseq  ;;  %v609_v1 = vmov 1983009808   ;;  %s709_s15 = smov (!%p206_p4, %s599_s15), 1  ;;  %vm262_vm0 = vcmask 1041408   ;;  %v610_v6 = vmov 0   ;;  %v432_v16 = vld [vmem:[%s701_s2] sm:$0xff] }
   0xd   : > { %v235_v2 = vunpack.c.l.s4 %v609_v1  ;;  %s553_s19 = smul.u32 6, %s709_s15  ;;  %301 = vmatprep.mubr.bf16.mxu0 %v610_v6  ;;  %360 = vmatprep.mubr.bf16.mxu1 %v610_v6  ;;  %vm258_vm1 = vcmask 31744   ;;  %v223_v15 = vld [vmem:[%s700_s1] sm:$0xf]  ;;  %vm255_vm2 = vcmask 916480   ;;  %vm377_vm3 = vcmask 785408  }
   0xe   : > { %v238_v3 = vshrl.u32 %v237_v0, 7  ;;  %582 = vset.pattern.permute.xlu0 %v610_v6  ;;  %583 = vset.pattern.permute.xlu1 %v610_v6  ;;  %v440_v17 = vld [vmem:[%s702_s3] sm:$0xff]  ;;  %v547_v31 = vld [vmem:[%s700_s1 + $0x8] sm:$0xf]  ;;  %s552_s9 = sshll.u32 %s709_s15, 4 }
   0xf   : > { %v236_v4 = vunpack.c.0.s8 %v235_v2  ;;  %s210_s22 = scalar_lea.vmem %s699_s0, %s553_s19  ;;  %v541_v25 = vld [vmem:[%s700_s1 + $0x4] sm:$0xf]  ;;  %s219_s12 = scalar_lea.vmem %s703_s4, %s552_s9 }
  0x10   : > { %v231_v7 = vld [vmem:[%s210_s22] sm:$0x3f] }
  0x11   : > { %v239_v5 = vsub.s32 %v236_v4, %v238_v3  ;;  %v544_v8 = vld.sshfl [vmem:[%s210_s22] sm:$0x33 pattern:$0x76325410]  ;;  %v233_v10 = vcombine.high %v231_v7, %v231_v7 }
  0x12   : > { %v318_v11 = vcombine.high %v544_v8, %v544_v8  ;;  %v323_v12 = vsel %vm262_vm0, %v544_v8, 0 }
  0x13   : > { %v240_v9 = vrot.slane %v231_v7, %v239_v5  ;;  %v247_v13 = vrot.slane %v233_v10, %v239_v5 }
  0x14   : > { %545 = vmatprep.subr.msk.bf16.mxu1 %vm262_vm0, %v318_v11 }
  0x15   : > { %249 = vrot.lane.b32.xlu0 %v240_v9, %s611_s23  ;;  %v248_v14 = vcombine.high %v240_v9, %v240_v9  ;;  %343 = vmatpush1.bf16.msra.mxu1 %v323_v12 }
  0x16   : > { %253 = vrot.lane.b32.xlu1 %v247_v13, %s611_s23 }
  0x18   : > { %546 = vmatmul.mubr.msk.bf16.vlgmr.msra.gmra.mxu1 %vm258_vm1, %v223_v15 }
  0x19   : > { %251 = vrot.lane.b32.xlu0 %v248_v14, %s611_s23 }
  0x1a   : > { %371 = vrot.lane.b32.xlu1 %v240_v9, %s612_s26 }
  0x1d   : > { %373 = vrot.lane.b32.xlu0 %v248_v14, %s612_s26 }
  0x1e   : > { %375 = vrot.lane.b32.xlu1 %v247_v13, %s612_s26 }
  0x21   : > { %435 = vperm.xlu0 %582, %v432_v16  }
  0x22   : > { %443 = vperm.xlu1 %583, %v440_v17  }
  0x87   : > { %v250_v18 = vpop.permute.xlu0 %249 }
  0x88   : > { %v254_v19 = vpop.permute.xlu1 %253 }
  0x8b   : > { %v252_v20 = vpop.permute.xlu0 %251 }
  0x8c   : > { %v257_v21 = vsel %vm255_vm2, %v252_v20, %v254_v19  ;;  %v256_v22 = vsel %vm255_vm2, %v250_v18, %v252_v20  ;;  %v372_v23 = vpop.permute.xlu1 %371 }
  0x8d   : > { %542 = vmatprep.subr.msk.bf16.mxu0 %vm262_vm0, %v257_v21  ;;  %v264_v24 = vsel %vm262_vm0, %v256_v22, 0 }
  0x8e   : > { %284 = vmatpush1.bf16.msra.mxu0 %v264_v24 }
  0x8f   : > { %v374_v26 = vpop.permute.xlu0 %373 }
  0x90   : > { %v378_v27 = vsel %vm377_vm3, %v372_v23, %v374_v26  ;;  %v376_v28 = vpop.permute.xlu1 %375 }
  0x91   : > { %543 = vmatmul.mubr.msk.bf16.vlgmr.msra.gmra.mxu0 %vm258_vm1, %v541_v25  ;;  %v379_v29 = vsel %vm377_vm3, %v374_v26, %v376_v28  ;;  %v384_v30 = vsel %vm262_vm0, %v378_v27, 0 }
  0x92   : > { %421 = vmatprep.mubr.bf16.mxu0 %v610_v6  ;;  %548 = vmatprep.subr.msk.bf16.mxu0 %vm262_vm0, %v379_v29 }
  0x93   : > { %404 = vmatpush1.bf16.msra.mxu0 %v384_v30 }
  0x99   : > { %549 = vmatmul.mubr.msk.bf16.vlgmr.msra.gmra.mxu0 %vm258_vm1, %v547_v31 }
  0x9c   : > { %v436_v42 = vpop.permute.xlu0 %435 }
  0x9d   : > { %v444_v46 = vpop.permute.xlu1 %443 }
  0xd8   : > { %v362_v32 = vpop.f32.mrf.mxu1 }
  0xda   : > { %v364_v33 = vpop.f32.mrf.mxu1 }
  0xdc   : > { %v366_v34 = vpop.f32.mrf.mxu1 }
  0xde   : > { %v367_v35 = vpop.f32.mrf.mxu1 }
 0x151   : > { %v303_v36 = vpop.f32.mrf.mxu0 }
 0x152   : > { %v363_v40 = vadd.f32 %v362_v32, %v303_v36 }
 0x153   : > { %v305_v37 = vpop.f32.mrf.mxu0 }
 0x154   : > { %v365_v43 = vadd.f32 %v364_v33, %v305_v37 }
 0x155   : > { %v307_v38 = vpop.f32.mrf.mxu0 }
 0x157   : > { %v308_v39 = vpop.f32.mrf.mxu0 }
 0x159   : > { %v423_v41 = vpop.f32.mrf.mxu0 }
 0x15a   : > { %v430_v44 = vadd.f32 %v423_v41, %v363_v40 }
 0x15b   : > { %v425_v45 = vpop.f32.mrf.mxu0 }
 0x15c   : > { %v438_v47 = vmul.f32 %v436_v42, %v430_v44  ;;  %v431_v48 = vadd.f32 %v425_v45, %v365_v43 }
 0x15d   : > { %v427_v49 = vpop.f32.mrf.mxu0 }
 0x15e   : > { %v439_v50 = vmul.f32 %v436_v42, %v431_v48  ;;  %v446_v51 = vadd.f32 %v444_v46, %v438_v47 }
 0x15f   : > { %v428_v52 = vpop.f32.mrf.mxu0 }
 0x160   : > { %v447_v53 = vadd.f32 %v444_v46, %v439_v50  ;;  %448 = vst [vmem:[%s219_s12] sm:$0xff] %v446_v51 }
 0x162   : > { %449 = vst [vmem:[%s219_s12 + $0x8] sm:$0xff] %v447_v53 }
 0x163 PF: > { %s14_s17 = sadd.s32 1, %s607_s17   ;;  %s704_s15 = smov %s603_s16 }
 0x164   : > { %p11_p5 = scmp.ge.s32.totalorder %s14_s17, 4   ;;  %s705_s16 = smov %s707_s18 }
 0x166   :  { %13 = sbr.rel (!%p11_p5) target bundleno = 2 (0x2), region = 69 }

</bundles_post_ra>
